<compile_context>
chip_gen: v7x
topology: tpu7x:2x2x1
jax: 0.10.0
libtpu: 0.0.40
codegen_flags: <defaults>
</compile_context>

<pallas_src>
import functools

import numpy as np
import jax
import jax.numpy as jnp
from jax import lax
from jax.experimental import pallas as pl
from jax.experimental.pallas import tpu as pltpu

_MASK_VALUE = -1e30


def _device_kind():
    try:
        return jax.devices()[0].device_kind.lower()
    except Exception:
        return ""


_KIND = _device_kind()

# Per-generation VMEM budget: leave headroom below physical (v7x: 64 MiB/TC,
# v5e/v6e: 128 MiB).  Unknown parts get a conservative 64 MiB.
if "v7" in _KIND:
    _VMEM_LIMIT_BYTES = 48 * 1024 * 1024
elif ("v5 lite" in _KIND) or ("v5e" in _KIND) or ("v6" in _KIND):
    _VMEM_LIMIT_BYTES = 112 * 1024 * 1024
else:
    _VMEM_LIMIT_BYTES = 64 * 1024 * 1024

# v5e (1 vector-store slot, 197 TF/s MXU) prefers smaller attention tiles so the
# per-head (tq, tk) f32 temporaries don't spill; v6e/v7x take the larger tiles.
if ("v5 lite" in _KIND) or ("v5e" in _KIND):
    _ATTN_TQ_CAP, _ATTN_TKV_CAP = 128, 256
else:
    _ATTN_TQ_CAP, _ATTN_TKV_CAP = 256, 512


def _sublane_align(dtype):
    # 8 for f32, 16 for bf16, 32 for int8/fp8: packed rows per vreg sublane tile.
    return max(8, 32 // max(jnp.dtype(dtype).itemsize, 1))


def _pick_tile(dim, cap, align):
    """Largest `align`-aligned divisor of `dim` that is <= cap, else `dim` itself."""
    if dim <= cap:
        return dim
    t = (cap // align) * align
    while t >= align:
        if dim % t == 0:
            return t
        t -= align
    return dim  # fallback: single block spanning the full dim


# ---------------------------------------------------------------------------
# Kernel 1: tiled linear + bias (c_attn QKV projection and c_proj)
# ---------------------------------------------------------------------------
def _linear_bias_kernel(x_ref, w_ref, b_ref, o_ref, acc_ref, *, mxu_dtype):
    @pl.when(pl.program_id(2) == 0)
    def _():
        acc_ref[...] = jnp.zeros_like(acc_ref)

    x = x_ref[...]
    w = w_ref[...]
    if mxu_dtype is not None:
        x = x.astype(mxu_dtype)
        w = w.astype(mxu_dtype)
    acc_ref[...] += jnp.dot(x, w, preferred_element_type=jnp.float32)

    @pl.when(pl.program_id(2) == pl.num_programs(2) - 1)
    def _():
        o_ref[...] = (acc_ref[...] + b_ref[...].astype(jnp.float32)).astype(o_ref.dtype)


def linear_bias(x, w_t, b, *, tm_cap=256, tn_cap=512, tk_cap=1024, mxu_dtype=None):
    # x: [M, K]; w_t: [K, N] (already transposed from the PyTorch [N, K] layout); b: [N]
    M, K = x.shape
    Kw, N = w_t.shape
    assert Kw == K
    sub = _sublane_align(x.dtype if mxu_dtype is None else mxu_dtype)
    # Prefer MXU-shaped (128/256-aligned) M tiles when M allows it.
    if M % 256 == 0:
        tm_align = 256
    elif M % 128 == 0:
        tm_align = 128
    else:
        tm_align = sub
    tm = _pick_tile(M, tm_cap, tm_align)
    tn = _pick_tile(N, tn_cap, 128)
    tk = _pick_tile(K, tk_cap, 128)
    grid = (M // tm, N // tn, K // tk)
    itemsize = jnp.dtype(x.dtype).itemsize
    kernel = functools.partial(_linear_bias_kernel, mxu_dtype=mxu_dtype)
    return pl.pallas_call(
        kernel,
        out_shape=jax.ShapeDtypeStruct((M, N), x.dtype),
        grid_spec=pltpu.PrefetchScalarGridSpec(
            num_scalar_prefetch=0,
            grid=grid,
            in_specs=[
                pl.BlockSpec((tm, tk), lambda i, j, k: (i, k)),
                pl.BlockSpec((tk, tn), lambda i, j, k: (k, j)),
                pl.BlockSpec((1, tn), lambda i, j, k: (0, j)),
            ],
            out_specs=pl.BlockSpec((tm, tn), lambda i, j, k: (i, j)),
            scratch_shapes=[pltpu.VMEM((tm, tn), jnp.float32)],
        ),
        compiler_params=pltpu.CompilerParams(
            dimension_semantics=("parallel", "parallel", "arbitrary"),
            vmem_limit_bytes=_VMEM_LIMIT_BYTES),
        cost_estimate=pl.CostEstimate(
            flops=2 * M * N * K,
            transcendentals=0,
            bytes_accessed=(M * K + K * N + M * N + N) * itemsize),
    )(x, w_t, b.reshape(1, N))


# ---------------------------------------------------------------------------
# Kernel 2: reshape_and_cache — batched async-DMA scatter of the T new K/V rows
# into the HBM caches (aliased input->output, only touched rows move).
# The K/V columns are read directly from the qkv buffer (no wrapper slices).
# ---------------------------------------------------------------------------
def _kv_cache_write_kernel(slots_ref, ksrc_ref, vsrc_ref, kc_in, vc_in,
                           kc_out, vc_out, sem, *, rows_per_block, total_rows):
    del kc_in, vc_in   # aliased: their HBM buffers *are* the output buffers
    base = pl.program_id(0) * rows_per_block

    def k_copy(r, slot):
        return pltpu.make_async_copy(ksrc_ref.at[r], kc_out.at[slot, 0], sem.at[0])

    def v_copy(r, slot):
        return pltpu.make_async_copy(vsrc_ref.at[r], vc_out.at[slot, 0], sem.at[1])

    # Issue all row DMAs for this block, then wait for all of them: many copies
    # in flight instead of one (1, d) transfer per grid step.
    @pl.loop(0, rows_per_block)
    def _issue(r):
        @pl.when(base + r < total_rows)
        def _():
            slot = slots_ref[base + r]
            k_copy(r, slot).start()
            v_copy(r, slot).start()

    @pl.loop(0, rows_per_block)
    def _wait(r):
        @pl.when(base + r < total_rows)
        def _():
            slot = slots_ref[base + r]
            k_copy(r, slot).wait()
            v_copy(r, slot).wait()


def reshape_and_cache(qkv, k_cache, v_cache, slots, num_heads, head_dim):
    # qkv: [T, (H+2)*d]; caches: [S, 1, d]; slots: [T] int32 (assumed unique, as
    # in serving — each new token gets its own cache slot).
    T = qkv.shape[0]
    H, d = num_heads, head_dim
    slots = slots.astype(jnp.int32)

    aligned = (d % 128 == 0) and (k_cache.dtype == qkv.dtype)
    if aligned:
        k_src = v_src = qkv
        k_blk, v_blk = H, H + 1          # column-block offsets inside qkv
    else:
        # Fallback for unaligned head dims / dtype mismatch: explicit slices.
        k_src = qkv[:, H * d:(H + 1) * d].astype(k_cache.dtype)
        v_src = qkv[:, (H + 1) * d:(H + 2) * d].astype(v_cache.dtype)
        k_blk = v_blk = 0

    R = _pick_tile(T, 128, 8)            # tokens per grid step
    nblk = pl.cdiv(T, R)
    kernel = functools.partial(_kv_cache_write_kernel,
                               rows_per_block=R, total_rows=T)
    return pl.pallas_call(
        kernel,
        out_shape=(jax.ShapeDtypeStruct(k_cache.shape, k_cache.dtype),
                   jax.ShapeDtypeStruct(v_cache.shape, v_cache.dtype)),
        grid_spec=pltpu.PrefetchScalarGridSpec(
            num_scalar_prefetch=1,       # slots -> SMEM
            grid=(nblk,),
            in_specs=[
                pl.BlockSpec((R, d), lambda i, slots: (i, k_blk)),   # K rows of qkv
                pl.BlockSpec((R, d), lambda i, slots: (i, v_blk)),   # V rows of qkv
                pl.BlockSpec(memory_space=pl.ANY),                   # k_cache (aliased)
                pl.BlockSpec(memory_space=pl.ANY),                   # v_cache (aliased)
            ],
            out_specs=(pl.BlockSpec(memory_space=pl.ANY),
                       pl.BlockSpec(memory_space=pl.ANY)),
            scratch_shapes=[pltpu.SemaphoreType.DMA((2,))],
        ),
        # Call args are (slots, k_src, v_src, k_cache, v_cache): alias caches -> outputs.
        input_output_aliases={3: 0, 4: 1},
        compiler_params=pltpu.CompilerParams(
            # Slots are unique -> no write race; "parallel" lets v7x use both cores.
            dimension_semantics=("parallel",)),
    )(slots, k_src, v_src, k_cache, v_cache)


# ---------------------------------------------------------------------------
# Kernel 3: prefill MQA flash attention (causal, varlen via segment ids)
# grid = (q_tiles, kv_tiles); heads are processed inside the kernel so the shared
# K/V tile and the (tq, tk) mask are built once and reused across all heads.
# Softmax scale is pre-folded into the Q projection weights.
# ---------------------------------------------------------------------------
def _mqa_flash_kernel(kvmin_ref, segq_ref, segk_ref, q_ref, k_ref, v_ref, o_ref,
                      m_ref, l_ref, acc_ref, *, num_heads, head_dim, mxu_dtype):
    H, d = num_heads, head_dim
    tq = q_ref.shape[0]
    tk = k_ref.shape[0]
    qi = pl.program_id(0)
    ki = pl.program_id(1)
    nk = pl.num_programs(1)
    q_start = qi * tq
    k_start = ki * tk

    @pl.when(ki == 0)
    def _init():
        m_ref[...] = jnp.full(m_ref.shape, _MASK_VALUE, m_ref.dtype)
        l_ref[...] = jnp.zeros(l_ref.shape, l_ref.dtype)
        acc_ref[...] = jnp.zeros(acc_ref.shape, acc_ref.dtype)

    # Skip KV tiles strictly in the causal future of this q tile and KV tiles
    # entirely before the q tile's segment start (fully masked cross-segment tiles).
    @pl.when((k_start < q_start + tq) & (ki >= kvmin_ref[qi]))
    def _compute():
        k = k_ref[...]            # (tk, d)  shared KV head (MQA)
        v = v_ref[...]            # (tk, d)
        q_all = q_ref[...]        # (tq, H*d) lane-dense
        if mxu_dtype is not None:
            k = k.astype(mxu_dtype)
            v = v.astype(mxu_dtype)
            q_all = q_all.astype(mxu_dtype)

        # Mask is identical for all heads: build once per (q-tile, kv-tile).
        rows = q_start + lax.broadcasted_iota(jnp.int32, (tq, tk), 0)
        cols = k_start + lax.broadcasted_iota(jnp.int32, (tq, tk), 1)
        mask = (cols <= rows) & (segq_ref[...] == segk_ref[...])

        # TODO(synk): for H >= 16 switch to lax.fori_loop(unroll=2-4) over heads to
        # bound vreg live ranges (static unroll is fine at small H).
        for h in range(H):
            q_h = q_all[:, h * d:(h + 1) * d]                    # (tq, d)
            s = lax.dot_general(q_h, k, (((1,), (1,)), ((), ())),
                                preferred_element_type=jnp.float32)
            s = jnp.where(mask, s, _MASK_VALUE)                  # stats kept in f32

            m_prev = m_ref[h]                                    # (tq, 1)
            m_new = jnp.maximum(m_prev, jnp.max(s, axis=-1, keepdims=True))
            alpha = jnp.exp(m_prev - m_new)
            # Explicitly zero masked probs: robust even when a row has seen no
            # valid key yet (m_new == _MASK_VALUE), no reliance on exp underflow.
            p = jnp.where(mask, jnp.exp(s - m_new), 0.0)
            l_ref[h] = alpha * l_ref[h] + jnp.sum(p, axis=-1, keepdims=True)
            acc_ref[h] = alpha * acc_ref[h] + lax.dot_general(
                p.astype(v.dtype), v, (((1,), (0,)), ((), ())),
                preferred_element_type=jnp.float32)
            m_ref[h] = m_new

    @pl.when(ki == nk - 1)
    def _finalize():
        for h in range(H):
            inv_l = pl.reciprocal(l_ref[h], approx=True)         # EUP slot, off VALU
            o_ref[:, h * d:(h + 1) * d] = (acc_ref[h] * inv_l).astype(o_ref.dtype)


def mqa_prefill_attention(qkv, seg, cu_seqlens, num_heads, head_dim, *,
                          mxu_dtype=None, tq_cap=None, tkv_cap=None):
    # qkv: [T, (H+2)*d] (Q | K | V columns); seg: [T] int32 segment ids;
    # cu_seqlens: [num_seqs + 1] int32 sequence starts.
    T = qkv.shape[0]
    H, d = num_heads, head_dim
    if tq_cap is None:
        tq_cap = _ATTN_TQ_CAP
    if tkv_cap is None:
        tkv_cap = _ATTN_TKV_CAP
    dtype = qkv.dtype

    aligned = (d % 128 == 0) and ((H * d) % 128 == 0)
    if aligned:
        # Read Q / K / V in place from qkv via column-offset BlockSpecs.
        q_src = k_src = v_src = qkv
        q_blk, k_blk, v_blk = 0, H, H + 1
    else:
        # Fallback for tiny / unaligned head dims (extra HBM copies).
        q_src = qkv[:, : H * d]
        k_src = qkv[:, H * d:(H + 1) * d]
        v_src = qkv[:, (H + 1) * d:(H + 2) * d]
        q_blk = k_blk = v_blk = 0

    sub = _sublane_align(dtype if mxu_dtype is None else mxu_dtype)
    tq = _pick_tile(T, tq_cap, sub)
    tk = _pick_tile(T, tkv_cap, 128)
    nq, nk = T // tq, T // tk

    # Per-q-tile first relevant kv block: kv tiles entirely before the segment
    # start of the tile's first row are fully masked for every row in the tile.
    q_first = jnp.arange(nq, dtype=jnp.int32) * tq
    kv_min_blk = (cu_seqlens[seg[q_first]] // tk).astype(jnp.int32)

    def kv_block(qi, ki, kvmin):
        # Clamp so skipped tiles (causal future / pre-segment) reuse the resident
        # block instead of issuing a new DMA.
        last = (qi * tq + tq - 1) // tk
        return jnp.minimum(jnp.maximum(ki, kvmin[qi]), last)

    kernel = functools.partial(_mqa_flash_kernel, num_heads=H, head_dim=d,
                               mxu_dtype=mxu_dtype)
    itemsize = jnp.dtype(dtype).itemsize
    return pl.pallas_call(
        kernel,
        out_shape=jax.ShapeDtypeStruct((T, H * d), dtype),
        grid_spec=pltpu.PrefetchScalarGridSpec(
            num_scalar_prefetch=1,   # kv_min_blk -> SMEM (used by index_maps + guard)
            grid=(nq, nk),
            in_specs=[
                pl.BlockSpec((tq, 1), lambda qi, ki, kvmin: (qi, 0)),      # seg rows
                pl.BlockSpec((1, tk),
                             lambda qi, ki, kvmin: (0, kv_block(qi, ki, kvmin))),  # seg cols
                pl.BlockSpec((tq, H * d), lambda qi, ki, kvmin: (qi, q_blk)),      # Q tile
                pl.BlockSpec((tk, d),
                             lambda qi, ki, kvmin: (kv_block(qi, ki, kvmin), k_blk)),  # K tile
                pl.BlockSpec((tk, d),
                             lambda qi, ki, kvmin: (kv_block(qi, ki, kvmin), v_blk)),  # V tile
            ],
            out_specs=pl.BlockSpec((tq, H * d), lambda qi, ki, kvmin: (qi, 0)),
            scratch_shapes=[
                pltpu.VMEM((H, tq, 1), jnp.float32),   # m
                pltpu.VMEM((H, tq, 1), jnp.float32),   # l
                pltpu.VMEM((H, tq, d), jnp.float32),   # acc
            ],
        ),
        compiler_params=pltpu.CompilerParams(
            dimension_semantics=("parallel", "arbitrary"),
            vmem_limit_bytes=_VMEM_LIMIT_BYTES),
        cost_estimate=pl.CostEstimate(
            flops=2 * H * T * T * d,            # ~causal half of dense
            transcendentals=H * T * T // 2,
            bytes_accessed=(T * (H + 2) * d + T * H * d + 4 * T) * itemsize),
    )(kv_min_blk, seg.reshape(T, 1), seg.reshape(1, T), q_src, k_src, v_src)


# ---------------------------------------------------------------------------
# Module wrapper (parameter setup / cheap glue are plain JAX)
# ---------------------------------------------------------------------------
class FlashMQAttentionPallas:
    def __init__(self, num_heads, hidden_size, dtype=jnp.float32, seed=0,
                 mxu_dtype=None):
        # mxu_dtype: optional compute dtype for MXU matmuls (e.g. jnp.bfloat16 for
        # f32 params); None keeps the native dtype to preserve f32 semantics.
        assert hidden_size % num_heads == 0
        self.num_heads = num_heads
        self.hidden_size = hidden_size
        self.head_size = hidden_size // num_heads
        self.softmax_scale = self.head_size ** -0.5
        self.mxu_dtype = mxu_dtype
        out_qkv = (num_heads + 2) * self.head_size
        k0, k1, k2, k3 = jax.random.split(jax.random.PRNGKey(seed), 4)
        # PyTorch Linear layout [out_features, in_features] (kept for the reference path).
        self.c_attn_weight = (0.02 * jax.random.normal(k0, (out_qkv, hidden_size))).astype(dtype)
        self.c_attn_bias = (0.02 * jax.random.normal(k1, (out_qkv,))).astype(dtype)
        self.c_proj_weight = (0.02 * jax.random.normal(k2, (hidden_size, num_heads * self.head_size))).astype(dtype)
        self.c_proj_bias = (0.02 * jax.random.normal(k3, (hidden_size,))).astype(dtype)
        # Pre-transposed once; softmax scale folded into the Q columns of c_attn
        # (K/V columns multiplied by exactly 1.0, so the cache contents are unchanged).
        scale_col = jnp.concatenate([
            jnp.full((num_heads * self.head_size,), self.softmax_scale, jnp.float32),
            jnp.ones((2 * self.head_size,), jnp.float32)])
        w_t = jnp.asarray(self.c_attn_weight.T)
        self.c_attn_weight_t_scaled = (w_t.astype(jnp.float32) * scale_col[None, :]).astype(dtype)
        self.c_attn_bias_scaled = (self.c_attn_bias.astype(jnp.float32) * scale_col).astype(dtype)
        self.c_proj_weight_t = jnp.asarray(self.c_proj_weight.T)

    def __call__(self, hidden_states, cu_seqlen_prefill, kv_cache, slots):
        T = hidden_states.shape[0]
        H, d = self.num_heads, self.head_size

        # qkv = self.c_attn(hidden_states)  — tiled, pipelined matmul (scale folded in)
        qkv = linear_bias(hidden_states, self.c_attn_weight_t_scaled,
                          self.c_attn_bias_scaled, mxu_dtype=self.mxu_dtype)

        # paged_attention.reshape_and_cache: batched DMA scatter of the T new rows,
        # reading the K/V columns of qkv in place.
        k_cache, v_cache = reshape_and_cache(qkv, kv_cache[0], kv_cache[1], slots, H, d)

        # prefill flash attention (causal, varlen via cu_seqlen_prefill -> segment ids)
        positions = jnp.arange(T, dtype=jnp.int32)
        inner = cu_seqlen_prefill[1:-1]
        if inner.shape[0] > 0:
            seg = jnp.sum(positions[:, None] >= inner[None, :], axis=1).astype(jnp.int32)
        else:
            seg = jnp.zeros((T,), jnp.int32)

        attn = mqa_prefill_attention(qkv, seg, cu_seqlen_prefill.astype(jnp.int32),
                                     H, d, mxu_dtype=self.mxu_dtype)   # (T, H*d)

        # return self.c_proj(attn_output)
        out = linear_bias(attn, self.c_proj_weight_t, self.c_proj_bias,
                          mxu_dtype=self.mxu_dtype)
        # TODO(synk): decode-time paged_attention path (block_tables / seqlen / max_s)
        # is not implemented; only the prefill (cu_seqlen_prefill is not None) branch is.
        return out, (k_cache, v_cache)


# ---------------------------------------------------------------------------
# Pure-JAX reference for verification
# ---------------------------------------------------------------------------
def reference_forward(mod, x, cu, kv_cache, slots):
    hp = jax.lax.Precision.HIGHEST
    T = x.shape[0]
    H, d = mod.num_heads, mod.head_size
    qkv = jnp.dot(x, mod.c_attn_weight.T, precision=hp) + mod.c_attn_bias
    query = qkv[:, : H * d].reshape(T, H, d)
    key_value = qkv[:, H * d:].reshape(T, 2, 1, d)
    key, value = key_value[:, 0], key_value[:, 1]
    kc = kv_cache[0].at[slots].set(key)
    vc = kv_cache[1].at[slots].set(value)

    positions = jnp.arange(T)
    inner = cu[1:-1]
    seg = (jnp.sum(positions[:, None] >= inner[None, :], axis=1)
           if inner.shape[0] > 0 else jnp.zeros((T,), jnp.int32))
    s = jnp.einsum('thd,sd->hts', query, key[:, 0], precision=hp) * mod.softmax_scale
    row = jnp.arange(T)[:, None]
    col = jnp.arange(T)[None, :]
    mask = (col <= row) & (seg[:, None] == seg[None, :])
    s = jnp.where(mask[None], s, -1e30)
    p = jax.nn.softmax(s, axis=-1)
    attn = jnp.einsum('hts,sd->thd', p, value[:, 0], precision=hp).reshape(T, H * d)
    out = jnp.dot(attn, mod.c_proj_weight.T, precision=hp) + mod.c_proj_bias
    return out, (kc, vc)


if __name__ == "__main__":
    num_heads = 4
    head_size = 128                         # santacoder/gpt_bigcode head size
    hidden_size = num_heads * head_size     # 512
    T = 16                                  # total tokens (2 prefill sequences)
    num_slots = 48

    key = jax.random.PRNGKey(0)
    kx, _ = jax.random.split(key)
    hidden_states = jax.random.normal(kx, (T, hidden_size), dtype=jnp.float32)
    cu_seqlen_prefill = jnp.array([0, 9, 16], dtype=jnp.int32)   # seq lens 9 and 7
    kv_cache = (jnp.zeros((num_slots, 1, head_size), jnp.float32),
                jnp.zeros((num_slots, 1, head_size), jnp.float32))
    slots = jnp.arange(T, dtype=jnp.int32) + 3                   # unique cache slots

    mod = FlashMQAttentionPallas(num_heads, hidden_size)
    out, (kc, vc) = mod(hidden_states, cu_seqlen_prefill, kv_cache, slots)
    jax.block_until_ready((out, kc, vc))

    ref_out, (ref_kc, ref_vc) = reference_forward(mod, hidden_states, cu_seqlen_prefill,
                                                  kv_cache, slots)
    # Output tolerance covers approx reciprocal + online-softmax reordering.
    np.testing.assert_allclose(np.asarray(out), np.asarray(ref_out), rtol=5e-3, atol=5e-4)
    np.testing.assert_allclose(np.asarray(kc), np.asarray(ref_kc), rtol=1e-4, atol=1e-5)
    np.testing.assert_allclose(np.asarray(vc), np.asarray(ref_vc), rtol=1e-4, atol=1e-5)

    print("KERNEL_OK")
</pallas_src>

<mosaic_0001>
module attributes {stable_mosaic.version = 11 : i64} {
  func.func @_linear_bias_kernel(%arg0: i32, %arg1: i32, %arg2: i32, %arg3: memref<16x512xf32, #tpu.memory_space<vmem>>, %arg4: memref<512x384xf32, #tpu.memory_space<vmem>>, %arg5: memref<1x384xf32, #tpu.memory_space<vmem>>, %arg6: memref<16x384xf32, #tpu.memory_space<vmem>>, %arg7: memref<16x384xf32, #tpu.memory_space<vmem>>) attributes {dimension_semantics = [#tpu.dimension_semantics<parallel>, #tpu.dimension_semantics<parallel>, #tpu.dimension_semantics<arbitrary>], iteration_bounds = array<i64: 1, 2, 1>, scalar_prefetch = 0 : i64, scratch_operands = 1 : i64, tpu.core_type = #tpu.core_type<tc>, window_params = [{transform_indices = @transform_0, window_bounds = array<i64: 16, 512>}, {transform_indices = @transform_1, window_bounds = array<i64: 512, 384>}, {transform_indices = @transform_2, window_bounds = array<i64: 1, 384>}, {transform_indices = @transform_3, window_bounds = array<i64: 16, 384>}]} {
    %c0_i32 = arith.constant 0 : i32
    %0 = arith.cmpi eq, %arg2, %c0_i32 : i32
    %1 = arith.extui %0 : i1 to i32
    %c0_i32_0 = arith.constant 0 : i32
    %2 = arith.cmpi ne, %1, %c0_i32_0 : i32
    scf.if %2 {
      %cst_10 = arith.constant 0.000000e+00 : f32
      %12 = vector.broadcast %cst_10 : f32 to vector<16x384xf32>
      %c0_11 = arith.constant 0 : index
      %c0_12 = arith.constant 0 : index
      %13 = vector.load %arg7[%c0_11, %c0_12] : memref<16x384xf32, #tpu.memory_space<vmem>>, vector<16x384xf32>
      tpu.vector_store %arg7[%c0_11, %c0_12], %12 {strides = array<i32>} : memref<16x384xf32, #tpu.memory_space<vmem>>, vector<16x384xf32>,
    } else {
    }
    %c0 = arith.constant 0 : index
    %c0_1 = arith.constant 0 : index
    %3 = vector.load %arg3[%c0, %c0_1] : memref<16x512xf32, #tpu.memory_space<vmem>>, vector<16x512xf32>
    %c0_2 = arith.constant 0 : index
    %c0_3 = arith.constant 0 : index
    %4 = vector.load %arg4[%c0_2, %c0_3] : memref<512x384xf32, #tpu.memory_space<vmem>>, vector<512x384xf32>
    %c0_4 = arith.constant 0 : index
    %c0_5 = arith.constant 0 : index
    %5 = vector.load %arg7[%c0_4, %c0_5] : memref<16x384xf32, #tpu.memory_space<vmem>>, vector<16x384xf32>
    %cst = arith.constant dense<0.000000e+00> : vector<16x384xf32>
    %6 = tpu.matmul %3, %4, %cst {dimension_numbers = #tpu.dot_dimension_numbers<[1], [0], [0], [1], [0, 0, 1, 1], [], []>} : vector<16x512xf32>, vector<512x384xf32>, vector<16x384xf32> -> vector<16x384xf32>
    %7 = arith.addf %5, %6 : vector<16x384xf32>
    %c0_6 = arith.constant 0 : index
    %c0_7 = arith.constant 0 : index
    %8 = vector.load %arg7[%c0_6, %c0_7] : memref<16x384xf32, #tpu.memory_space<vmem>>, vector<16x384xf32>
    tpu.vector_store %arg7[%c0_6, %c0_7], %7 {strides = array<i32>} : memref<16x384xf32, #tpu.memory_space<vmem>>, vector<16x384xf32>,
    %c0_i32_8 = arith.constant 0 : i32
    %9 = arith.cmpi eq, %arg2, %c0_i32_8 : i32
    %10 = arith.extui %9 : i1 to i32
    %c0_i32_9 = arith.constant 0 : i32
    %11 = arith.cmpi ne, %10, %c0_i32_9 : i32
    scf.if %11 {
      %c0_10 = arith.constant 0 : index
      %c0_11 = arith.constant 0 : index
      %12 = vector.load %arg7[%c0_10, %c0_11] : memref<16x384xf32, #tpu.memory_space<vmem>>, vector<16x384xf32>
      %c0_12 = arith.constant 0 : index
      %c0_13 = arith.constant 0 : index
      %13 = vector.load %arg5[%c0_12, %c0_13] : memref<1x384xf32, #tpu.memory_space<vmem>>, vector<1x384xf32>
      %14 = vector.broadcast %13 : vector<1x384xf32> to vector<16x384xf32>
      %15 = arith.addf %12, %14 : vector<16x384xf32>
      %c0_14 = arith.constant 0 : index
      %c0_15 = arith.constant 0 : index
      %16 = vector.load %arg6[%c0_14, %c0_15] : memref<16x384xf32, #tpu.memory_space<vmem>>, vector<16x384xf32>
      tpu.vector_store %arg6[%c0_14, %c0_15], %15 {strides = array<i32>} : memref<16x384xf32, #tpu.memory_space<vmem>>, vector<16x384xf32>,
    } else {
    }
    return
  }
  func.func @transform_0(%arg0: i32, %arg1: i32, %arg2: i32) -> (i32, i32) {
    %c0_i32 = arith.constant 0 : i32
    return %arg0, %arg2 : i32, i32
  }
  func.func @transform_1(%arg0: i32, %arg1: i32, %arg2: i32) -> (i32, i32) {
    %c0_i32 = arith.constant 0 : i32
    return %arg2, %arg1 : i32, i32
  }
  func.func @transform_2(%arg0: i32, %arg1: i32, %arg2: i32) -> (i32, i32) {
    %c0_i32 = arith.constant 0 : i32
    %c0_i32_0 = arith.constant 0 : i32
    return %c0_i32, %arg1 : i32, i32
  }
  func.func @transform_3(%arg0: i32, %arg1: i32, %arg2: i32) -> (i32, i32) {
    %c0_i32 = arith.constant 0 : i32
    return %arg0, %arg1 : i32, i32
  }
}

</mosaic_0001>

<bundles_post_ra>
// kernel: tpu_custom_call.1
= control target key start
LH: loop header
LB: loop body
LE: loop exit
PB: predicated region body
PF: predicated region fallthrough
CT: control target
= control target key end

     0   :  { %s2066_s0 = inlined_call_operand.hbm [shape: f32[16,512], index: 0, kind: input, shape index: {}]   ;;  %s2067_s1 = inlined_call_operand.hbm [shape: f32[512,768], index: 1, kind: input, shape index: {}]   ;;  %s2068_s2 = inlined_call_operand.hbm [shape: f32[1,768], index: 2, kind: input, shape index: {}]   ;;  %s2069_s3 = inlined_call_operand.hbm [shape: f32[16,768], index: 3, kind: output, shape index: {}]  }
   0x1   :  { %2078 = sst [smem:[#allocation14_spill]] %s2067_s1 }
   0x2   :  { %8 = vsyncpa [#allocation4], 0 }
   0x3   :  { %9 = vsyncpa [#allocation7], 0 }
   0x4   :  { %11 = vsyncpa [#allocation7 + $0x1], 0 }
   0x5   :  { %12 = vsyncpa [#allocation5], 0 }
   0x6   :  { %14 = vsyncpa [#allocation5 + $0x1], 0  ;;  %s1585_s12 = smov 0   ;;  %s1587_s13 = smov 0  }
   0x7   :  { %s1589_s14 = smov 0   ;;  %s1591_s15 = smov 0  }
   0x8   :  { %s1593_s16 = smov 0   ;;  %s1595_s17 = smov 0  }
   0x9 LB: > { %s35_s18 = sadd.s32 1, %s1547_s16  ;;  %s76_s19 = sadd.s32 1, %s1539_s14  ;;  %s1551_s17 = sphi %s1595_s17, %s20_s17   ;;  %s1547_s16 = sphi %s1593_s16, %s2102_s16   ;;  %s1543_s15 = sphi %s1591_s15, %s2101_s15   ;;  %s1539_s14 = sphi %s1589_s14, %s2100_s14   ;;  %s1535_s13 = sphi %s1587_s13, %s2099_s13   ;;  %s1531_s12 = sphi %s1585_s12, %s2098_s12  }
   0xa   : > { %p37_p0 = scmp.ge.s32.totalorder %s35_s18, 2  ;;  %p83_p1 = scmp.ne.s32.totalorder %s1539_s14, %s1535_s13 }
   0xb   : > { %p84_p2 = scmp.eq.s32.totalorder %s1551_s17, 0  ;;  %p1317_p5 = scmp.lt.s32.totalorder %s1551_s17, 2 }
   0xc   : > { %s2104_s18 = smov (%p37_p0, %s35_s18), 0  ;;  %s186_s21 = sand.u32 1, %s1551_s17  }
   0xd   : > { %2079 = sst [smem:[#allocation13_spill]] %s2104_s18  ;;  %p85_p4 = por %p84_p2, %p83_p1 }
   0xe   : > { %s72_s20 = ssub.s32 %s1547_s16, %s2104_s18  ;;  %s188_s22 = sand.u32 1, %s1539_s14  }
   0xf   : > { %p74_p6 = scmp.eq.s32.totalorder %s72_s20, 0  ;;  %s1011_s23 = smul.u32 384, %s1547_s16 }
  0x10   : > { %s1286_s25 = smul.u32 1536, %s188_s22  ;;  %s2080_s1 = sld [smem:[#allocation14_spill]] }
  0x11   : > { %s1633_s24 = scalar_select %p74_p6, %s1539_s14, %s76_s19  }
  0x12   : > { %p1642_p7 = pnand %p1317_p5, %p85_p4  ;;  %s190_s30 = scalar_lea.vmem [#allocation6], %s1286_s25 }
  0x13   : > { %s200_s4 = sshll.u32 %s190_s30, 4  ;;  %s1648_s5 = scalar_lea.sflag [#allocation7], %s186_s21  ;;  %s1646_s4 = int_to_ptr.vmem [resolvable:$true] %s200_s4 }
  0x14   : > { %s2081_s29 = scalar_select %p1642_p7, 1, 0 }
  0x15   : > { %p2072_p9 = pneg %p1642_p7 }
  0x16   : > { %s1640_s28 = scalar_lea.hbm %s2080_s1, %s1011_s23  ;;  %s1382_s9 = scalar_lea.hbm %s2080_s1, 49152 }
  0x17   : > { %s1377_s6 = scalar_lea.hbm %s1640_s28, 24576  ;;  %p1383_p12 = scmp.lt.u32.totalorder %s1640_s28, %s2080_s1 }
  0x18   : > { %p1378_p8 = scmp.ne.s32.totalorder %s1640_s28, %s1377_s6  ;;  %p1384_p13 = scmp.lt.u32.totalorder %s1382_s9, %s1377_s6 }
  0x19   : > { %p1386_p2 = scmp.lt.u32.totalorder %s1377_s6, %s1640_s28 }
  0x1a   : > { %p1380_p10 = pnand %p2072_p9, %p1378_p8  ;;  %p1385_p0 = por %p1384_p13, %p1383_p12 }
  0x1c   : > { %p1381_p11 = pneg %p1380_p10  ;;  %p1387_p4 = por %p1386_p2, %p1385_p0 }
  0x1e   : > { %p1388_p5 = pnand %p1387_p4, %p1381_p11 }
  0x20   : > { %1391 = shalt.err (!%p1388_p5)
}
  0x21   : > { %s1392_s19 = scalar_lea.vmem %s1646_s4, 24576  ;;  %s1553_s20 = smov [#allocation6]  }
  0x22   : > { %p1393_p6 = scmp.ne.s32.totalorder %s1646_s4, %s1392_s19  ;;  %s1397_s21 = sshll.u32 %s1553_s20, 4  ;;  %s1398_s21 = int_to_ptr.vmem [resolvable:$false] %s1397_s21 }
  0x23   : > { %s1399_s23 = scalar_lea.vmem %s1398_s21, 49152  ;;  %p1400_p3 = scmp.lt.s32.totalorder %s1646_s4, %s1398_s21 }
  0x24   : > { %p1395_p8 = pnand %p1393_p6, %p2072_p9  ;;  %p1401_p12 = scmp.lt.s32.totalorder %s1399_s23, %s1392_s19 }
  0x26   : > { %p1396_p10 = pneg %p1395_p8  ;;  %p1402_p13 = por %p1401_p12, %p1400_p3 }
  0x28   : > { %p1403_p0 = pnand %p1402_p13, %p1396_p10 }
  0x2a   : > { %1406 = shalt.err (!%p1403_p0)
}
  0x2b   : > { %s1554_s25 = smov 768   ;;  %s1555_s26 = smov 384  }
  0x2c   : > { %s1556_s27 = smov 24   ;;  %s1677_s30 = sadd.s32 4294967295, %s1551_s17  }
  0x2d   : > { %1308 = dma.hbm_to_vmem [thread:$0]  (!%p1642_p7), %s1640_s28, 24576, %s1646_s4, %s1648_s5, %s1554_s25, %s1555_s26, %s1556_s27  }
  0x2e   : > { %s1000_s6 = sadd.s32 4294967294, %s1551_s17   ;;  %p89_p3 = scmp.ne.s32.totalorder %s1535_s13, %s1531_s12 }
  0x2f   : > { %p2071_p11 = scmp.eq.s32.totalorder %s1677_s30, 0  ;;  %p141_p2 = scmp.eq.s32.totalorder %s1677_s30, 1 }
  0x30   : > { %p147_p4 = scmp.eq.s32.totalorder %s1000_s6, 1  ;;  %p1001_p6 = scmp.ge.s32.totalorder %s1551_s17, 1 }
  0x31   : > { %p1686_p5 = por %p2071_p11, %p89_p3  ;;  %p1694_p8 = por %p141_p2, %p83_p1 }
  0x32   : > { %p1698_p10 = por %p147_p4, %p89_p3  ;;  %p154_p12 = scmp.lt.s32.totalorder %s1551_s17, 3 }
  0x33   : > { %s2082_s7 = scalar_select %p1686_p5, 1, 0 }
  0x34   : > { %s2083_s28 = scalar_select %p1694_p8, 1, 0 }
  0x35   : > { %s2084_s4 = scalar_select %p1698_p10, 1, 0 }
  0x36   : > { %p1703_p13 = pnand %p1001_p6, %p154_p12  ;;  %s1557_s9 = smov [#allocation3]  }
  0x37   : > { %s172_s10 = sshll.u32 %s1557_s9, 4  ;;  %s1287_s11 = smul.u32 3, %s188_s22  ;;  %s1707_s10 = int_to_ptr.vmem [resolvable:$true] %s172_s10 }
  0x38   : > { %s2085_s8 = scalar_select %p1703_p13, 1, 0 }
  0x39   : > { %p1301_p0 = pneg %p1703_p13  ;;  %s1012_s19 = smul.u32 48, %s1547_s16 }
  0x3a   : > { %s214_s26 = scalar_lea.vmem [#allocation8], %s1287_s11  ;;  %s1407_s22 = scalar_lea.hbm %s2066_s0, 1024 }
  0x3b   : > { %p1716_p1 = pnand %p1301_p0, %p2071_p11  ;;  %s1723_s25 = scalar_lea.hbm %s2068_s2, %s1012_s19 }
  0x3c   : > { %s222_s27 = sshll.u32 %s214_s26, 4  ;;  %p1408_p3 = scmp.ne.s32.totalorder %s2066_s0, %s1407_s22  ;;  %s1725_s27 = int_to_ptr.vmem [resolvable:$true] %s222_s27 }
  0x3d   : > { %p1409_p2 = pneg %p1716_p1  ;;  %p1414_p12 = scmp.lt.u32.totalorder %s1407_s22, %s2066_s0 }
  0x3f   : > { %p1410_p4 = pnand %p1409_p2, %p1408_p3 }
  0x41   : > { %p1411_p6 = pneg %p1410_p4 }
  0x43   : > { %p1416_p0 = pnand %p1414_p12, %p1411_p6 }
  0x45   : > { %1419 = shalt.err (!%p1416_p0)
}
  0x46   : > { %s1420_s11 = scalar_lea.vmem %s1707_s10, 1024  ;;  %p1428_p8 = scmp.lt.s32.totalorder %s1707_s10, %s1707_s10 }
  0x47   : > { %p1421_p11 = scmp.ne.s32.totalorder %s1707_s10, %s1420_s11  ;;  %p1429_p5 = scmp.lt.s32.totalorder %s1420_s11, %s1420_s11 }
  0x49   : > { %p1423_p9 = pnand %p1421_p11, %p1409_p2  ;;  %p1430_p13 = por %p1429_p5, %p1428_p8 }
  0x4b   : > { %p1424_p10 = pneg %p1423_p9 }
  0x4d   : > { %p1431_p7 = pnand %p1430_p13, %p1424_p10 }
  0x4f   : > { %1434 = shalt.err (!%p1431_p7)
}
  0x50   : > { %s1558_s1 = smov 512   ;;  %s1559_s18 = smov 32  }
  0x51   : > { %1304 = dma.hbm_to_vmem [thread:$0]  (!%p1716_p1), %s2066_s0, 1024, %s1707_s10, [#allocation4], %s1558_s1, %s1558_s1, %s1559_s18  }
  0x52   : > { %s1435_s6 = scalar_lea.hbm %s1723_s25, 48  ;;  %p2087_p11 = scmp.ne.s32.totalorder %s2081_s29, 0 }
  0x53   : > { %p1436_p9 = scmp.ne.s32.totalorder %s1723_s25, %s1435_s6  ;;  %s1440_s21 = scalar_lea.hbm %s2068_s2, 96 }
  0x54   : > { %p2088_p5 = pneg %p2087_p11  ;;  %p1441_p10 = scmp.lt.u32.totalorder %s1723_s25, %s2068_s2 }
  0x55   : > { %p1442_p13 = scmp.lt.u32.totalorder %s1440_s21, %s1435_s6  ;;  %p1444_p2 = scmp.lt.u32.totalorder %s1435_s6, %s1723_s25 }
  0x56   : > { %p1438_p8 = pnand %p1436_p9, %p2088_p5 }
  0x57   : > { %p1443_p3 = por %p1442_p13, %p1441_p10 }
  0x58   : > { %p1439_p7 = pneg %p1438_p8 }
  0x59   : > { %p1445_p4 = por %p1444_p2, %p1443_p3 }
  0x5b   : > { %p1446_p6 = pnand %p1445_p4, %p1439_p7 }
  0x5d   : > { %1449 = shalt.err (!%p1446_p6)
}
  0x5e   : > { %s1450_s10 = scalar_lea.vmem %s1725_s27, 48  ;;  %p2089_p12 = pmov %p2088_p5 }
  0x5f   : > { %p1451_p1 = scmp.ne.s32.totalorder %s1725_s27, %s1450_s10  ;;  %s1560_s20 = smov [#allocation8]  }
  0x60   : > { %s1455_s1 = sshll.u32 %s1560_s20, 4  ;;  %s1456_s1 = int_to_ptr.vmem [resolvable:$false] %s1455_s1 }
  0x61   : > { %p1453_p0 = pnand %p1451_p1, %p2089_p12  ;;  %s1457_s18 = scalar_lea.vmem %s1456_s1, 96 }
  0x62   : > { %p1458_p5 = scmp.lt.s32.totalorder %s1725_s27, %s1456_s1  ;;  %p1459_p8 = scmp.lt.s32.totalorder %s1457_s18, %s1450_s10 }
  0x63   : > { %p1454_p9 = pneg %p1453_p0 }
  0x64   : > { %p1460_p10 = por %p1459_p8, %p1458_p5 }
  0x66   : > { %p1461_p13 = pnand %p1460_p10, %p1454_p9 }
  0x68   : > { %1464 = shalt.err (!%p1461_p13)
}
  0x69   : > { %1311 = dma.hbm_to_vmem [thread:$0]  (!%p2087_p11), %s1723_s25, 48, %s1725_s27, %s1648_s5  }
  0x6a   : > { %p2090_p7 = scmp.ne.s32.totalorder %s2085_s8, 0 }
  0x6b   : > { %p2091_p3 = scmp.eq.s32.totalorder (!%p2090_p7), %s1677_s30, 0 }
  0x6c   : > { %231 = sbr.rel (%p2090_p7) target bundleno = 487 (0x1e7), region = 32 }
  0x73   : > { %1518 = dma.done.wait (%p2091_p3), [#allocation4], 1024   ;;  %p2092_p2 = pmov %p2091_p3 }
  0x74   : > { %s237_s19 = sand.u32 1, %s1677_s30   ;;  %s1780_s26 = sand.u32 1, %s1535_s13  }
  0x75   : > { %1520 = vsyncadd (%p2092_p2), [#allocation4], 4294966272  ;;  %s1288_s29 = smul.u32 1536, %s1780_s26  ;;  %s238_s6 = scalar_lea.sflag [#allocation7], %s237_s19 }
  0x76   : > { %p2093_p11 = scmp.ne.s32.totalorder %s2082_s7, 0 }
  0x77   : > { %s1783_s9 = scalar_lea.vmem [#allocation6], %s1288_s29 }
  0x78   : > { %1522 = dma.done.wait (%p2093_p11), %s238_s6, 24624  }
  0x79   : > { %1524 = vsyncadd (%p2093_p11), %s238_s6, 4294942672  ;;  %v304_v0 = vld [vmem:[%s1783_s9 + $0x8] sm:$0xff]  ;;  %v307_v1 = vld [vmem:[%s1783_s9 + $0x20] sm:$0xff]  ;;  %s1289_s5 = smul.u32 3, %s1780_s26  ;;  %p2094_p6 = scmp.ne.s32.totalorder %s2083_s28, 0 }
  0x7a   : > { %v303_v2 = vld [vmem:[%s1783_s9] sm:$0xff]  ;;  %v1090_v3 = vpack.c.bf16 %v307_v1, %v304_v0  ;;  %v306_v4 = vld [vmem:[%s1783_s9 + $0x18] sm:$0xff]  ;;  %v313_v6 = vld [vmem:[%s1783_s9 + $0x50] sm:$0xff]  ;;  %s1290_s7 = smul.u32 48, %s1780_s26  ;;  %s1561_s10 = smov [#allocation9]  }
  0x7b   : > { %v310_v5 = vld [vmem:[%s1783_s9 + $0x38] sm:$0xff]  ;;  %v1092_v7 = vpack.c.bf16 %v306_v4, %v303_v2  ;;  %v309_v9 = vld [vmem:[%s1783_s9 + $0x30] sm:$0xff]  ;;  %v312_v10 = vld [vmem:[%s1783_s9 + $0x48] sm:$0xff]  ;;  %s250_s30 = scalar_lea.vmem [#allocation8], %s1289_s5  ;;  %s1013_s27 = smul.u32 384, %s1543_s15 }
  0x7c   : > { %v1094_v8 = vpack.c.bf16 %v313_v6, %v310_v5  ;;  %v316_v11 = vld [vmem:[%s1783_s9 + $0x68] sm:$0xff]  ;;  %1091 = vmatprep.subr.bf16.mxu0 %v1090_v3  ;;  %v319_v12 = vld [vmem:[%s1783_s9 + $0x80] sm:$0xff]  ;;  %v1096_v13 = vpack.c.bf16 %v312_v10, %v309_v9  ;;  %v318_v16 = vld [vmem:[%s1783_s9 + $0x78] sm:$0xff]  ;;  %s277_s8 = scalar_lea.vmem [#allocation9], %s1290_s7  ;;  %s856_s15 = scalar_lea.sflag [#allocation5], %s1780_s26 }
  0x7d   : > { %1093 = vmatpush1.bf16.msra.mxu0 %v1092_v7  ;;  %v1098_v14 = vpack.c.bf16 %v319_v12, %v316_v11  ;;  %v315_v15 = vld [vmem:[%s1783_s9 + $0x60] sm:$0xff]  ;;  %v322_v17 = vld [vmem:[%s1783_s9 + $0x98] sm:$0xff]  ;;  %v325_v18 = vld [vmem:[%s1783_s9 + $0xb0] sm:$0xff]  ;;  %s872_s25 = sshll.u32 %s277_s8, 4  ;;  %s2017_s23 = scalar_lea.hbm %s2069_s3, %s1013_s27  ;;  %s2012_s25 = int_to_ptr.vmem [resolvable:$true] %s872_s25 }
  0x7e   : > { %1095 = vmatprep.subr.bf16.mxu0 %v1094_v8  ;;  %v1100_v19 = vpack.c.bf16 %v318_v16, %v315_v15  ;;  %v1102_v20 = vpack.c.bf16 %v325_v18, %v322_v17  ;;  %v321_v21 = vld [vmem:[%s1783_s9 + $0x90] sm:$0xff]  ;;  %v324_v22 = vld [vmem:[%s1783_s9 + $0xa8] sm:$0xff]  ;;  %v331_v24 = vld [vmem:[%s1783_s9 + $0xe0] sm:$0xff]  ;;  %s1465_s11 = scalar_lea.vmem %s2012_s25, 768  ;;  %s1469_s20 = sshll.u32 %s1561_s10, 4  ;;  %s1470_s20 = int_to_ptr.vmem [resolvable:$false] %s1469_s20 }
  0x7f   : > { %v328_v23 = vld [vmem:[%s1783_s9 + $0xc8] sm:$0xff]  ;;  %v353_v25 = vld [vmem:[%s1783_s9 + $0x190] sm:$0xff]  ;;  %v1104_v30 = vpack.c.bf16 %v324_v22, %v321_v21  ;;  %v327_v31 = vld [vmem:[%s1783_s9 + $0xc0] sm:$0xff]  ;;  %p1466_p4 = scmp.ne.s32.totalorder %s2012_s25, %s1465_s11  ;;  %s1471_s1 = scalar_lea.vmem %s1470_s20, 1536 }
  0x80   : > { %v356_v26 = vld [vmem:[%s1783_s9 + $0x1a8] sm:$0xff]  ;;  %v305_v28 = vld [vmem:[%s1783_s9 + $0x10] sm:$0xff]  ;;  %v359_v33 = vld [vmem:[%s1783_s9 + $0x1c0] sm:$0xff]  ;;  %v1106_v34 = vpack.c.bf16 %v331_v24, %v328_v23  ;;  %p1472_p0 = scmp.lt.s32.totalorder %s2012_s25, %s1470_s20  ;;  %p1473_p9 = scmp.lt.s32.totalorder %s1471_s1, %s1465_s11 }
  0x81   : > { %1097 = vmatpush1.bf16.msra.mxu0 %v1096_v13  ;;  %v1218_v27 = vpack.c.bf16 %v356_v26, %v353_v25  ;;  %v308_v29 = vld [vmem:[%s1783_s9 + $0x28] sm:$0xff]  ;;  %v330_v35 = vld [vmem:[%s1783_s9 + $0xd8] sm:$0xff]  ;;  %v337_v38 = vld [vmem:[%s1783_s9 + $0x110] sm:$0xff]  ;;  %p1467_p1 = pnand %p1466_p4, %p2094_p6 }
  0x82   : > { %1099 = vmatprep.subr.bf16.mxu0 %v1098_v14  ;;  %v1220_v32 = vpack.c.bf16 %v308_v29, %v305_v28  ;;  %v334_v36 = vld [vmem:[%s1783_s9 + $0xf8] sm:$0xff]  ;;  %v311_v40 = vld [vmem:[%s1783_s9 + $0x40] sm:$0xff]  ;;  %v365_v43 = vld [vmem:[%s1783_s9 + $0x1f0] sm:$0xff]  ;;  %v1108_v45 = vpack.c.bf16 %v330_v35, %v327_v31  ;;  %p1474_p5 = por %p1473_p9, %p1472_p0 }
  0x83   : > { %1219 = vmatprep.subr.bf16.mxu1 %v1218_v27  ;;  %v362_v37 = vld [vmem:[%s1783_s9 + $0x1d8] sm:$0xff]  ;;  %v368_v44 = vld [vmem:[%s1783_s9 + $0x208] sm:$0xff]  ;;  %v333_v46 = vld [vmem:[%s1783_s9 + $0xf0] sm:$0xff]  ;;  %v1110_v49 = vpack.c.bf16 %v337_v38, %v334_v36  ;;  %p1468_p12 = pneg %p1467_p1 }
  0x84   : > { %1221 = vmatpush3.bf16.msra.mxu1 %v1220_v32  ;;  %v1222_v39 = vpack.c.bf16 %v362_v37, %v359_v33  ;;  %v314_v41 = vld [vmem:[%s1783_s9 + $0x58] sm:$0xff]  ;;  %v1226_v47 = vpack.c.bf16 %v368_v44, %v365_v43  ;;  %v317_v48 = vld [vmem:[%s1783_s9 + $0x70] sm:$0xff]  ;;  %v336_v50 = vld [vmem:[%s1783_s9 + $0x108] sm:$0xff] }
  0x85   : > { %1101 = vmatpush1.bf16.msra.mxu0 %v1100_v19  ;;  %v1224_v42 = vpack.c.bf16 %v314_v41, %v311_v40  ;;  %v340_v51 = vld [vmem:[%s1783_s9 + $0x128] sm:$0xff]  ;;  %v343_v53 = vld [vmem:[%s1783_s9 + $0x140] sm:$0xff]  ;;  %v374_v56 = vld [vmem:[%s1783_s9 + $0x238] sm:$0xff]  ;;  %v1112_v60 = vpack.c.bf16 %v336_v50, %v333_v46  ;;  %p1475_p8 = pnand %p1474_p5, %p1468_p12 }
  0x86   : > { %1103 = vmatprep.subr.bf16.mxu0 %v1102_v20  ;;  %1223 = vmatprep.subr.bf16.mxu1 %v1222_v39  ;;  %v320_v52 = vld [vmem:[%s1783_s9 + $0x88] sm:$0xff]  ;;  %v371_v55 = vld [vmem:[%s1783_s9 + $0x220] sm:$0xff]  ;;  %v326_v59 = vld [vmem:[%s1783_s9 + $0xb8] sm:$0xff]  ;;  %v1114_v62 = vpack.c.bf16 %v343_v53, %v340_v51 }
  0x87   : > { %v1228_v54 = vpack.c.bf16 %v320_v52, %v317_v48  ;;  %v1230_v57 = vpack.c.bf16 %v374_v56, %v371_v55  ;;  %v323_v58 = vld [vmem:[%s1783_s9 + $0xa0] sm:$0xff]  ;;  %v377_v61 = vld [vmem:[%s1783_s9 + $0x250] sm:$0xff]  ;;  %v342_v0 = vld [vmem:[%s1783_s9 + $0x138] sm:$0xff] }
  0x88   : > { %1225 = vmatpush3.bf16.msra.mxu1 %v1224_v42  ;;  %v339_v63 = vld [vmem:[%s1783_s9 + $0x120] sm:$0xff]  ;;  %v380_v1 = vld [vmem:[%s1783_s9 + $0x268] sm:$0xff]  ;;  %v346_v2 = vld [vmem:[%s1783_s9 + $0x158] sm:$0xff]  ;;  %v1232_v4 = vpack.c.bf16 %v326_v59, %v323_v58 }
  0x89   : > { %1105 = vmatpush1.bf16.msra.mxu0 %v1104_v30  ;;  %1227 = vmatprep.subr.bf16.mxu1 %v1226_v47  ;;  %v349_v3 = vld [vmem:[%s1783_s9 + $0x170] sm:$0xff]  ;;  %v1234_v5 = vpack.c.bf16 %v380_v1, %v377_v61  ;;  %v332_v7 = vld [vmem:[%s1783_s9 + $0xe8] sm:$0xff]  ;;  %v1116_v8 = vpack.c.bf16 %v342_v0, %v339_v63  ;;  %v383_v9 = vld [vmem:[%s1783_s9 + $0x280] sm:$0xff] }
  0x8a   : > { %1107 = vmatprep.subr.bf16.mxu0 %v1106_v34  ;;  %v329_v6 = vld [vmem:[%s1783_s9 + $0xd0] sm:$0xff]  ;;  %v386_v10 = vld [vmem:[%s1783_s9 + $0x298] sm:$0xff]  ;;  %v1118_v11 = vpack.c.bf16 %v349_v3, %v346_v2  ;;  %v348_v13 = vld [vmem:[%s1783_s9 + $0x168] sm:$0xff] }
  0x8b   : > { %v345_v12 = vld [vmem:[%s1783_s9 + $0x150] sm:$0xff]  ;;  %v352_v14 = vld [vmem:[%s1783_s9 + $0x188] sm:$0xff]  ;;  %v355_v15 = vld [vmem:[%s1783_s9 + $0x1a0] sm:$0xff]  ;;  %v1236_v16 = vpack.c.bf16 %v332_v7, %v329_v6  ;;  %v1238_v17 = vpack.c.bf16 %v386_v10, %v383_v9 }
  0x8c   : > { %1229 = vmatpush3.bf16.msra.mxu1 %v1228_v54  ;;  %v335_v18 = vld [vmem:[%s1783_s9 + $0x100] sm:$0xff]  ;;  %v338_v19 = vld [vmem:[%s1783_s9 + $0x118] sm:$0xff]  ;;  %v1120_v20 = vpack.c.bf16 %v348_v13, %v345_v12  ;;  %v389_v21 = vld [vmem:[%s1783_s9 + $0x2b0] sm:$0xff]  ;;  %v1122_v23 = vpack.c.bf16 %v355_v15, %v352_v14 }
  0x8d   : > { %1109 = vmatpush1.bf16.msra.mxu0 %v1108_v45  ;;  %1231 = vmatprep.subr.bf16.mxu1 %v1230_v57  ;;  %v392_v22 = vld [vmem:[%s1783_s9 + $0x2c8] sm:$0xff]  ;;  %v351_v24 = vld [vmem:[%s1783_s9 + $0x180] sm:$0xff]  ;;  %v354_v25 = vld [vmem:[%s1783_s9 + $0x198] sm:$0xff]  ;;  %v1240_v28 = vpack.c.bf16 %v338_v19, %v335_v18 }
  0x8e   : > { %1111 = vmatprep.subr.bf16.mxu0 %v1110_v49  ;;  %v358_v26 = vld [vmem:[%s1783_s9 + $0x1b8] sm:$0xff]  ;;  %v361_v27 = vld [vmem:[%s1783_s9 + $0x1d0] sm:$0xff]  ;;  %v1242_v29 = vpack.c.bf16 %v392_v22, %v389_v21  ;;  %v344_v31 = vld [vmem:[%s1783_s9 + $0x148] sm:$0xff]  ;;  %v1124_v33 = vpack.c.bf16 %v354_v25, %v351_v24 }
  0x8f   : > { %v341_v30 = vld [vmem:[%s1783_s9 + $0x130] sm:$0xff]  ;;  %v296_v32 = vld [vmem:[#allocation3 + $0x8] sm:$0xff]  ;;  %v395_v34 = vld [vmem:[%s1783_s9 + $0x2e0] sm:$0xff]  ;;  %v1126_v36 = vpack.c.bf16 %v361_v27, %v358_v26 }
  0x90   : > { %1233 = vmatpush3.bf16.msra.mxu1 %v1232_v4  ;;  %v398_v35 = vld [vmem:[%s1783_s9 + $0x2f8] sm:$0xff]  ;;  %719 = vmatprep.mubr.f32.mxu1 %v296_v32  ;;  %v357_v37 = vld [vmem:[%s1783_s9 + $0x1b0] sm:$0xff]  ;;  %v360_v38 = vld [vmem:[%s1783_s9 + $0x1c8] sm:$0xff]  ;;  %v1244_v41 = vpack.c.bf16 %v344_v31, %v341_v30 }
  0x91   : > { %1113 = vmatpush1.bf16.msra.mxu0 %v1112_v60  ;;  %1235 = vmatprep.subr.bf16.mxu1 %v1234_v5  ;;  %v364_v39 = vld [vmem:[%s1783_s9 + $0x1e8] sm:$0xff]  ;;  %v367_v40 = vld [vmem:[%s1783_s9 + $0x200] sm:$0xff]  ;;  %v1246_v42 = vpack.c.bf16 %v398_v35, %v395_v34  ;;  %v350_v44 = vld [vmem:[%s1783_s9 + $0x178] sm:$0xff]  ;;  %v1128_v45 = vpack.c.bf16 %v360_v38, %v357_v37 }
  0x92   : > { %1115 = vmatprep.subr.bf16.mxu0 %v1114_v62  ;;  %565 = vmatprep.mubr.f32.mxu0 %v296_v32  ;;  %v347_v43 = vld [vmem:[%s1783_s9 + $0x160] sm:$0xff]  ;;  %v449_v46 = vld [vmem:[%s1783_s9 + $0x490] sm:$0xff]  ;;  %v452_v47 = vld [vmem:[%s1783_s9 + $0x4a8] sm:$0xff]  ;;  %v1130_v48 = vpack.c.bf16 %v367_v40, %v364_v39 }
  0x93   : > { %v363_v49 = vld [vmem:[%s1783_s9 + $0x1e0] sm:$0xff]  ;;  %v366_v50 = vld [vmem:[%s1783_s9 + $0x1f8] sm:$0xff]  ;;  %v373_v52 = vld [vmem:[%s1783_s9 + $0x230] sm:$0xff]  ;;  %v1248_v53 = vpack.c.bf16 %v350_v44, %v347_v43  ;;  %v1250_v54 = vpack.c.bf16 %v452_v47, %v449_v46 }
  0x94   : > { %1237 = vmatpush3.bf16.msra.mxu1 %v1236_v16  ;;  %v370_v51 = vld [vmem:[%s1783_s9 + $0x218] sm:$0xff]  ;;  %v401_v55 = vld [vmem:[%s1783_s9 + $0x310] sm:$0xff]  ;;  %v404_v56 = vld [vmem:[%s1783_s9 + $0x328] sm:$0xff]  ;;  %v1132_v57 = vpack.c.bf16 %v366_v50, %v363_v49 }
  0x95   : > { %1117 = vmatpush1.bf16.msra.mxu0 %v1116_v8  ;;  %1239 = vmatprep.subr.bf16.mxu1 %v1238_v17  ;;  %v455_v58 = vld [vmem:[%s1783_s9 + $0x4c0] sm:$0xff]  ;;  %v458_v59 = vld [vmem:[%s1783_s9 + $0x4d8] sm:$0xff]  ;;  %v1134_v60 = vpack.c.bf16 %v373_v52, %v370_v51  ;;  %v369_v61 = vld [vmem:[%s1783_s9 + $0x210] sm:$0xff]  ;;  %v1252_v2 = vpack.c.bf16 %v404_v56, %v401_v55 }
  0x96   : > { %1119 = vmatprep.subr.bf16.mxu0 %v1118_v11  ;;  %v372_v62 = vld [vmem:[%s1783_s9 + $0x228] sm:$0xff]  ;;  %v379_v0 = vld [vmem:[%s1783_s9 + $0x260] sm:$0xff]  ;;  %v1254_v3 = vpack.c.bf16 %v458_v59, %v455_v58  ;;  %v410_v5 = vld [vmem:[%s1783_s9 + $0x358] sm:$0xff] }
  0x97   : > { %v376_v63 = vld [vmem:[%s1783_s9 + $0x248] sm:$0xff]  ;;  %v1877_v1 = vld [vmem:[#allocation3] sm:$0xff]  ;;  %v1136_v6 = vpack.c.bf16 %v372_v62, %v369_v61  ;;  %v461_v7 = vld [vmem:[%s1783_s9 + $0x4f0] sm:$0xff] }
  0x98   : > { %1241 = vmatpush3.bf16.msra.mxu1 %v1240_v28  ;;  %v407_v4 = vld [vmem:[%s1783_s9 + $0x340] sm:$0xff]  ;;  %v464_v8 = vld [vmem:[%s1783_s9 + $0x508] sm:$0xff]  ;;  %v1138_v9 = vpack.c.bf16 %v379_v0, %v376_v63  ;;  %v378_v11 = vld [vmem:[%s1783_s9 + $0x258] sm:$0xff] }
  0x99   : > { %1121 = vmatpush1.bf16.msra.mxu0 %v1120_v20  ;;  %1243 = vmatprep.subr.bf16.mxu1 %v1242_v29  ;;  %v375_v10 = vld [vmem:[%s1783_s9 + $0x240] sm:$0xff]  ;;  %v382_v12 = vld [vmem:[%s1783_s9 + $0x278] sm:$0xff]  ;;  %v385_v13 = vld [vmem:[%s1783_s9 + $0x290] sm:$0xff]  ;;  %v1256_v14 = vpack.c.bf16 %v410_v5, %v407_v4  ;;  %v1258_v15 = vpack.c.bf16 %v464_v8, %v461_v7 }
  0x9a   : > { %1123 = vmatprep.subr.bf16.mxu0 %v1122_v23  ;;  %v413_v16 = vld [vmem:[%s1783_s9 + $0x370] sm:$0xff]  ;;  %v416_v17 = vld [vmem:[%s1783_s9 + $0x388] sm:$0xff]  ;;  %v1140_v18 = vpack.c.bf16 %v378_v11, %v375_v10  ;;  %v467_v19 = vld [vmem:[%s1783_s9 + $0x520] sm:$0xff]  ;;  %v1142_v21 = vpack.c.bf16 %v385_v13, %v382_v12 }
  0x9b   : > { %v470_v20 = vld [vmem:[%s1783_s9 + $0x538] sm:$0xff]  ;;  %v381_v22 = vld [vmem:[%s1783_s9 + $0x270] sm:$0xff]  ;;  %v384_v23 = vld [vmem:[%s1783_s9 + $0x288] sm:$0xff]  ;;  %v1260_v26 = vpack.c.bf16 %v416_v17, %v413_v16 }
  0x9c   : > { %1245 = vmatpush3.bf16.msra.mxu1 %v1244_v41  ;;  %v388_v24 = vld [vmem:[%s1783_s9 + $0x2a8] sm:$0xff]  ;;  %v391_v25 = vld [vmem:[%s1783_s9 + $0x2c0] sm:$0xff]  ;;  %v1262_v28 = vpack.c.bf16 %v470_v20, %v467_v19  ;;  %v422_v30 = vld [vmem:[%s1783_s9 + $0x3b8] sm:$0xff]  ;;  %v1144_v32 = vpack.c.bf16 %v384_v23, %v381_v22 }
  0x9d   : > { %1125 = vmatpush1.bf16.msra.mxu0 %v1124_v33  ;;  %1247 = vmatprep.subr.bf16.mxu1 %v1246_v42  ;;  %v1896_v27 = vld [vmem:[#allocation3 + $0x28] sm:$0xff]  ;;  %v419_v29 = vld [vmem:[%s1783_s9 + $0x3a0] sm:$0xff]  ;;  %v473_v33 = vld [vmem:[%s1783_s9 + $0x550] sm:$0xff]  ;;  %v1146_v35 = vpack.c.bf16 %v391_v25, %v388_v24 }
  0x9e   : > { %1127 = vmatprep.subr.bf16.mxu0 %v1126_v36  ;;  %v1901_v31 = vld [vmem:[#allocation3 + $0x20] sm:$0xff]  ;;  %v476_v34 = vld [vmem:[%s1783_s9 + $0x568] sm:$0xff]  ;;  %v390_v37 = vld [vmem:[%s1783_s9 + $0x2b8] sm:$0xff]  ;;  %v1264_v41 = vpack.c.bf16 %v422_v30, %v419_v29 }
  0x9f   : > { %v387_v36 = vld [vmem:[%s1783_s9 + $0x2a0] sm:$0xff]  ;;  %v1908_v38 = vld [vmem:[#allocation3 + $0x18] sm:$0xff]  ;;  %v397_v40 = vld [vmem:[%s1783_s9 + $0x2f0] sm:$0xff]  ;;  %v1266_v42 = vpack.c.bf16 %v476_v34, %v473_v33 }
  0xa0   : > { %1249 = vmatpush3.bf16.msra.mxu1 %v1248_v53  ;;  %v394_v39 = vld [vmem:[%s1783_s9 + $0x2d8] sm:$0xff]  ;;  %v425_v43 = vld [vmem:[%s1783_s9 + $0x3d0] sm:$0xff]  ;;  %v428_v44 = vld [vmem:[%s1783_s9 + $0x3e8] sm:$0xff] }
  0xa1   : > { %1129 = vmatpush1.bf16.msra.mxu0 %v1128_v45  ;;  %1251 = vmatprep.subr.bf16.mxu1 %v1250_v54  ;;  %v1148_v45 = vpack.c.bf16 %v390_v37, %v387_v36  ;;  %v479_v46 = vld [vmem:[%s1783_s9 + $0x580] sm:$0xff]  ;;  %v482_v47 = vld [vmem:[%s1783_s9 + $0x598] sm:$0xff]  ;;  %v393_v49 = vld [vmem:[%s1783_s9 + $0x2d0] sm:$0xff]  ;;  %v1268_v53 = vpack.c.bf16 %v428_v44, %v425_v43 }
  0xa2   : > { %1131 = vmatprep.subr.bf16.mxu0 %v1130_v48  ;;  %v1150_v48 = vpack.c.bf16 %v397_v40, %v394_v39  ;;  %v396_v50 = vld [vmem:[%s1783_s9 + $0x2e8] sm:$0xff]  ;;  %v403_v52 = vld [vmem:[%s1783_s9 + $0x320] sm:$0xff]  ;;  %v1270_v54 = vpack.c.bf16 %v482_v47, %v479_v46  ;;  %v434_v56 = vld [vmem:[%s1783_s9 + $0x418] sm:$0xff] }
  0xa3   : > { %720 = vmatmul.mubr.f32.vlgmr.msra.gmra.mrb[0].mxu1 %v1877_v1  ;;  %v400_v51 = vld [vmem:[%s1783_s9 + $0x308] sm:$0xff]  ;;  %v431_v55 = vld [vmem:[%s1783_s9 + $0x400] sm:$0xff]  ;;  %v485_v58 = vld [vmem:[%s1783_s9 + $0x5b0] sm:$0xff] }
  0xa4   : > { %1253 = vmatpush3.bf16.msra.mxu1 %v1252_v2  ;;  %724 = vmatprep.mubr.f32.mxu1 %v1896_v27  ;;  %v488_v59 = vld [vmem:[%s1783_s9 + $0x5c8] sm:$0xff]  ;;  %v399_v61 = vld [vmem:[%s1783_s9 + $0x300] sm:$0xff]  ;;  %v402_v62 = vld [vmem:[%s1783_s9 + $0x318] sm:$0xff]  ;;  %v1272_v2 = vpack.c.bf16 %v434_v56, %v431_v55 }
  0xa5   : > { %1133 = vmatpush1.bf16.msra.mxu0 %v1132_v57  ;;  %1255 = vmatprep.subr.bf16.mxu1 %v1254_v3  ;;  %v1152_v57 = vpack.c.bf16 %v396_v50, %v393_v49  ;;  %v406_v63 = vld [vmem:[%s1783_s9 + $0x338] sm:$0xff]  ;;  %v409_v0 = vld [vmem:[%s1783_s9 + $0x350] sm:$0xff]  ;;  %v1274_v3 = vpack.c.bf16 %v488_v59, %v485_v58  ;;  %v440_v5 = vld [vmem:[%s1783_s9 + $0x448] sm:$0xff] }
  0xa6   : > { %1135 = vmatprep.subr.bf16.mxu0 %v1134_v60  ;;  %v1154_v60 = vpack.c.bf16 %v403_v52, %v400_v51  ;;  %v437_v4 = vld [vmem:[%s1783_s9 + $0x430] sm:$0xff]  ;;  %v491_v7 = vld [vmem:[%s1783_s9 + $0x5e0] sm:$0xff]  ;;  %v494_v8 = vld [vmem:[%s1783_s9 + $0x5f8] sm:$0xff] }
  0xa7   : > { %725 = vmatmul.mubr.f32.gmra.mrb[2].mxu1 %v1901_v31  ;;  %v405_v10 = vld [vmem:[%s1783_s9 + $0x330] sm:$0xff]  ;;  %v408_v11 = vld [vmem:[%s1783_s9 + $0x348] sm:$0xff]  ;;  %v415_v13 = vld [vmem:[%s1783_s9 + $0x380] sm:$0xff] }
  0xa8   : > { %1257 = vmatpush3.bf16.msra.mxu1 %v1256_v14  ;;  %794 = vmatprep.mubr.f32.mxu1 %v1908_v38  ;;  %v412_v12 = vld [vmem:[%s1783_s9 + $0x368] sm:$0xff]  ;;  %v1276_v14 = vpack.c.bf16 %v440_v5, %v437_v4  ;;  %v443_v16 = vld [vmem:[%s1783_s9 + $0x460] sm:$0xff]  ;;  %v446_v17 = vld [vmem:[%s1783_s9 + $0x478] sm:$0xff] }
  0xa9   : > { %1137 = vmatpush1.bf16.msra.mxu0 %v1136_v6  ;;  %1259 = vmatprep.subr.bf16.mxu1 %v1258_v15  ;;  %v1156_v6 = vpack.c.bf16 %v402_v62, %v399_v61  ;;  %v1278_v15 = vpack.c.bf16 %v494_v8, %v491_v7  ;;  %v1162_v19 = vpack.c.bf16 %v415_v13, %v412_v12  ;;  %v411_v20 = vld [vmem:[%s1783_s9 + $0x360] sm:$0xff]  ;;  %v418_v22 = vld [vmem:[%s1783_s9 + $0x398] sm:$0xff]  ;;  %v421_v23 = vld [vmem:[%s1783_s9 + $0x3b0] sm:$0xff] }
  0xaa   : > { %1139 = vmatprep.subr.bf16.mxu0 %v1138_v9  ;;  %v1158_v9 = vpack.c.bf16 %v409_v0, %v406_v63  ;;  %v1166_v25 = vpack.c.bf16 %v421_v23, %v418_v22  ;;  %v427_v29 = vld [vmem:[%s1783_s9 + $0x3e0] sm:$0xff]  ;;  %v1951_v30 = vld [vmem:[#allocation3 + $0x10] sm:$0xff]  ;;  %v430_v36 = vld [vmem:[%s1783_s9 + $0x3f8] sm:$0xff] }
  0xab   : > { %v423_v34 = vld [vmem:[%s1783_s9 + $0x3c0] sm:$0xff]  ;;  %v433_v37 = vld [vmem:[%s1783_s9 + $0x410] sm:$0xff]  ;;  %v436_v43 = vld [vmem:[%s1783_s9 + $0x428] sm:$0xff] }
  0xac   : > { %1261 = vmatpush3.bf16.msra.mxu1 %v1260_v26  ;;  %v417_v26 = vld [vmem:[%s1783_s9 + $0x390] sm:$0xff]  ;;  %v1174_v40 = vpack.c.bf16 %v433_v37, %v430_v36  ;;  %v439_v44 = vld [vmem:[%s1783_s9 + $0x440] sm:$0xff]  ;;  %v442_v49 = vld [vmem:[%s1783_s9 + $0x458] sm:$0xff] }
  0xad   : > { %1141 = vmatpush1.bf16.msra.mxu0 %v1140_v18  ;;  %1263 = vmatprep.subr.bf16.mxu1 %v1262_v28  ;;  %v1160_v18 = vpack.c.bf16 %v408_v11, %v405_v10  ;;  %v424_v28 = vld [vmem:[%s1783_s9 + $0x3c8] sm:$0xff]  ;;  %v1178_v46 = vpack.c.bf16 %v439_v44, %v436_v43  ;;  %v435_v47 = vld [vmem:[%s1783_s9 + $0x420] sm:$0xff]  ;;  %v445_v50 = vld [vmem:[%s1783_s9 + $0x470] sm:$0xff] }
  0xae   : > { %1143 = vmatprep.subr.bf16.mxu0 %v1142_v21  ;;  %v414_v21 = vld [vmem:[%s1783_s9 + $0x378] sm:$0xff]  ;;  %v1170_v33 = vpack.c.bf16 %v427_v29, %v424_v28  ;;  %v1182_v52 = vpack.c.bf16 %v445_v50, %v442_v49  ;;  %v448_v55 = vld [vmem:[%s1783_s9 + $0x488] sm:$0xff]  ;;  %v451_v56 = vld [vmem:[%s1783_s9 + $0x4a0] sm:$0xff]  ;;  %v828_v49 = vlaneseq }
  0xaf   : > { %v1164_v24 = vpack.c.bf16 %v414_v21, %v411_v20  ;;  %v1186_v58 = vpack.c.bf16 %v451_v56, %v448_v55  ;;  %v447_v59 = vld [vmem:[%s1783_s9 + $0x480] sm:$0xff]  ;;  %v454_v61 = vld [vmem:[%s1783_s9 + $0x4b8] sm:$0xff]  ;;  %v457_v62 = vld [vmem:[%s1783_s9 + $0x4d0] sm:$0xff] }
  0xb0   : > { %1265 = vmatpush3.bf16.msra.mxu1 %v1264_v41  ;;  %v429_v41 = vld [vmem:[%s1783_s9 + $0x3f0] sm:$0xff]  ;;  %v1190_v0 = vpack.c.bf16 %v457_v62, %v454_v61  ;;  %v460_v4 = vld [vmem:[%s1783_s9 + $0x4e8] sm:$0xff]  ;;  %v463_v5 = vld [vmem:[%s1783_s9 + $0x500] sm:$0xff]  ;;  %v829_v50 = vshrl.u32 %v828_v49, 7 }
  0xb1   : > { %1145 = vmatpush1.bf16.msra.mxu0 %v1144_v32  ;;  %1267 = vmatprep.subr.bf16.mxu1 %v1266_v42  ;;  %v1953_v32 = vld [vmem:[#allocation3 + $0x38] sm:$0xff]  ;;  %v432_v42 = vld [vmem:[%s1783_s9 + $0x408] sm:$0xff]  ;;  %v1194_v7 = vpack.c.bf16 %v463_v5, %v460_v4  ;;  %v459_v8 = vld [vmem:[%s1783_s9 + $0x4e0] sm:$0xff] }
  0xb2   : > { %1147 = vmatprep.subr.bf16.mxu0 %v1146_v35  ;;  %v426_v35 = vld [vmem:[%s1783_s9 + $0x3d8] sm:$0xff]  ;;  %v469_v11 = vld [vmem:[%s1783_s9 + $0x530] sm:$0xff]  ;;  %v471_v20 = vld [vmem:[%s1783_s9 + $0x540] sm:$0xff]  ;;  %v830_v61 = vsub.s32 0, %v829_v50  ;;  %v834_v62 = vsub.s32 1, %v829_v50 }
  0xb3   : > { %v1172_v39 = vpack.c.bf16 %v426_v35, %v423_v34  ;;  %v466_v10 = vld [vmem:[%s1783_s9 + $0x518] sm:$0xff]  ;;  %v481_v23 = vld [vmem:[%s1783_s9 + $0x590] sm:$0xff]  ;;  %v487_v28 = vld [vmem:[%s1783_s9 + $0x5c0] sm:$0xff] }
  0xb4   : > { %1269 = vmatpush3.bf16.msra.mxu1 %v1268_v53  ;;  %v441_v53 = vld [vmem:[%s1783_s9 + $0x450] sm:$0xff]  ;;  %v1198_v13 = vpack.c.bf16 %v469_v11, %v466_v10  ;;  %v474_v21 = vld [vmem:[%s1783_s9 + $0x558] sm:$0xff] }
  0xb5   : > { %1149 = vmatpush1.bf16.msra.mxu0 %v1148_v45  ;;  %1271 = vmatprep.subr.bf16.mxu1 %v1270_v54  ;;  %v1176_v45 = vpack.c.bf16 %v432_v42, %v429_v41  ;;  %v444_v54 = vld [vmem:[%s1783_s9 + $0x468] sm:$0xff]  ;;  %v478_v22 = vld [vmem:[%s1783_s9 + $0x578] sm:$0xff]  ;;  %v493_v36 = vld [vmem:[%s1783_s9 + $0x5f0] sm:$0xff] }
  0xb6   : > { %1151 = vmatprep.subr.bf16.mxu0 %v1150_v48  ;;  %v438_v48 = vld [vmem:[%s1783_s9 + $0x438] sm:$0xff]  ;;  %v492_v41 = vld [vmem:[%s1783_s9 + $0x5e8] sm:$0xff] }
  0xb7   : > { %v1180_v51 = vpack.c.bf16 %v438_v48, %v435_v47  ;;  %v486_v34 = vld [vmem:[%s1783_s9 + $0x5b8] sm:$0xff] }
  0xb8   : > { %1273 = vmatpush3.bf16.msra.mxu1 %v1272_v2  ;;  %v453_v2 = vld [vmem:[%s1783_s9 + $0x4b0] sm:$0xff]  ;;  %v490_v35 = vld [vmem:[%s1783_s9 + $0x5d8] sm:$0xff] }
  0xb9   : > { %1153 = vmatpush1.bf16.msra.mxu0 %v1152_v57  ;;  %1275 = vmatprep.subr.bf16.mxu1 %v1274_v3  ;;  %v1184_v57 = vpack.c.bf16 %v444_v54, %v441_v53  ;;  %v456_v3 = vld [vmem:[%s1783_s9 + $0x4c8] sm:$0xff] }
  0xba   : > { %1155 = vmatprep.subr.bf16.mxu0 %v1154_v60  ;;  %v450_v60 = vld [vmem:[%s1783_s9 + $0x498] sm:$0xff] }
  0xbb   : > { %v1188_v63 = vpack.c.bf16 %v450_v60, %v447_v59 }
  0xbc   : > { %566 = vmatmul.mubr.f32.vlgmr.msra.gmra.mrb[0].mxu0 %v1877_v1  ;;  %1277 = vmatpush3.bf16.msra.mxu1 %v1276_v14  ;;  %v1280_v1 = vpack.c.bf16 %v446_v17, %v443_v16  ;;  %v465_v14 = vld [vmem:[%s1783_s9 + $0x510] sm:$0xff]  ;;  %v472_v16 = vld [vmem:[%s1783_s9 + $0x548] sm:$0xff]  ;;  %v475_v17 = vld [vmem:[%s1783_s9 + $0x560] sm:$0xff] }
  0xbd   : > { %1157 = vmatpush1.bf16.msra.mxu0 %v1156_v6  ;;  %571 = vmatprep.mubr.f32.mxu0 %v1896_v27  ;;  %v420_v27 = vld [vmem:[%s1783_s9 + $0x3a8] sm:$0xff]  ;;  %v1192_v6 = vpack.c.bf16 %v456_v3, %v453_v2 }
  0xbe   : > { %1159 = vmatprep.subr.bf16.mxu0 %v1158_v9  ;;  %1279 = vmatprep.subr.bf16.mxu1 %v1278_v15  ;;  %v462_v9 = vld [vmem:[%s1783_s9 + $0x4f8] sm:$0xff]  ;;  %v468_v15 = vld [vmem:[%s1783_s9 + $0x528] sm:$0xff] }
  0xbf   : > { %v1196_v12 = vpack.c.bf16 %v462_v9, %v459_v8 }
  0xc0   : > { %572 = vmatmul.mubr.f32.gmra.mrb[2].mxu0 %v1901_v31  ;;  %1281 = vmatpush3.bf16.msra.mxu1 %v1280_v1  ;;  %v1168_v31 = vpack.c.bf16 %v420_v27, %v417_v26  ;;  %v1204_v1 = vpack.c.bf16 %v474_v21, %v471_v20  ;;  %v480_v26 = vld [vmem:[%s1783_s9 + $0x588] sm:$0xff] }
  0xc1   : > { %1161 = vmatpush1.bf16.msra.mxu0 %v1160_v18  ;;  %642 = vmatprep.mubr.f32.mxu0 %v1908_v38  ;;  %v1961_v38 = vld [vmem:[#allocation3 + $0x30] sm:$0xff]  ;;  %v1200_v18 = vpack.c.bf16 %v468_v15, %v465_v14  ;;  %v484_v27 = vld [vmem:[%s1783_s9 + $0x5a8] sm:$0xff] }
  0xc2   : > { %1163 = vmatprep.subr.bf16.mxu0 %v1162_v19  ;;  %v1202_v19 = vpack.c.bf16 %v475_v17, %v472_v16 }
  0xc3   : > { %795 = vmatmul.mubr.f32.vlgmr.msra.gmra.mrb[4].mxu1 %v1951_v30 }
  0xc4   : > { %799 = vmatprep.mubr.f32.mxu1 %v1953_v32 }
  0xc5   : > { %1165 = vmatpush1.bf16.msra.mxu0 %v1164_v24  ;;  %v1206_v24 = vpack.c.bf16 %v481_v23, %v478_v22 }
  0xc6   : > { %1167 = vmatprep.subr.bf16.mxu0 %v1166_v25  ;;  %v477_v25 = vld [vmem:[%s1783_s9 + $0x570] sm:$0xff] }
  0xc7   : > { %800 = vmatmul.mubr.f32.gmra.mrb[6].mxu1 %v1961_v38  ;;  %v1208_v29 = vpack.c.bf16 %v480_v26, %v477_v25 }
  0xc9   : > { %1169 = vmatpush1.bf16.msra.mxu0 %v1168_v31  ;;  %v1210_v31 = vpack.c.bf16 %v487_v28, %v484_v27 }
  0xca   : > { %1171 = vmatprep.subr.bf16.mxu0 %v1170_v33  ;;  %v483_v33 = vld [vmem:[%s1783_s9 + $0x5a0] sm:$0xff] }
  0xcb   : > { %v1212_v37 = vpack.c.bf16 %v486_v34, %v483_v33 }
  0xcd   : > { %1173 = vmatpush1.bf16.msra.mxu0 %v1172_v39  ;;  %v1214_v39 = vpack.c.bf16 %v493_v36, %v490_v35 }
  0xce   : > { %1175 = vmatprep.subr.bf16.mxu0 %v1174_v40  ;;  %v489_v40 = vld [vmem:[%s1783_s9 + $0x5d0] sm:$0xff] }
  0xcf   : > { %v1216_v42 = vpack.c.bf16 %v492_v41, %v489_v40 }
  0xd1   : > { %1177 = vmatpush1.bf16.msra.mxu0 %v1176_v45 }
  0xd2   : > { %1179 = vmatprep.subr.bf16.mxu0 %v1178_v46 }
  0xd5   : > { %1181 = vmatpush1.bf16.msra.mxu0 %v1180_v51  ;;  %v838_v51 = vsub.s32 2, %v829_v50 }
  0xd6   : > { %1183 = vmatprep.subr.bf16.mxu0 %v1182_v52  ;;  %v826_v52 = vld [vmem:[%s250_s30] sm:$0x7] }
  0xd7   : > { %v839_v55 = vrot.slane %v826_v52, %v838_v51 }
  0xd9   : > { %1185 = vmatpush1.bf16.msra.mxu0 %v1184_v57 }
  0xda   : > { %1187 = vmatprep.subr.bf16.mxu0 %v1186_v58 }
  0xdd   : > { %1189 = vmatpush1.bf16.msra.mxu0 %v1188_v63  ;;  %v831_v63 = vrot.slane %v826_v52, %v830_v61 }
  0xde   : > { %1191 = vmatprep.subr.bf16.mxu0 %v1190_v0  ;;  %v835_v0 = vrot.slane %v826_v52, %v834_v62 }
  0xe1   : > { %1193 = vmatpush1.bf16.msra.mxu0 %v1192_v6 }
  0xe2   : > { %1195 = vmatprep.subr.bf16.mxu0 %v1194_v7 }
  0xe5   : > { %1197 = vmatpush1.bf16.msra.mxu0 %v1196_v12 }
  0xe6   : > { %1199 = vmatprep.subr.bf16.mxu0 %v1198_v13 }
  0xe9   : > { %1201 = vmatpush1.bf16.msra.mxu0 %v1200_v18 }
  0xea   : > { %1203 = vmatprep.subr.bf16.mxu0 %v1202_v19 }
  0xed   : > { %1205 = vmatpush1.bf16.msra.mxu0 %v1204_v1 }
  0xee   : > { %1207 = vmatprep.subr.bf16.mxu0 %v1206_v24 }
  0xf1   : > { %1209 = vmatpush1.bf16.msra.mxu0 %v1208_v29 }
  0xf2   : > { %1211 = vmatprep.subr.bf16.mxu0 %v1210_v31 }
  0xf5   : > { %1213 = vmatpush1.bf16.msra.mxu0 %v1212_v37 }
  0xf6   : > { %1215 = vmatprep.subr.bf16.mxu0 %v1214_v39 }
  0xf9   : > { %1217 = vmatpush1.bf16.msra.mxu0 %v1216_v42 }
  0xfc   : > { %643 = vmatmul.mubr.f32.vlgmr.msra.gmra.mrb[0].mxu0 %v1951_v30 }
  0xfd   : > { %648 = vmatprep.mubr.f32.mxu0 %v1953_v32 }
 0x100   : > { %649 = vmatmul.mubr.f32.gmra.mrb[2].mxu0 %v1961_v38 }
 0x176   : > { %v1046_v43 = vpop.f32.mrb[0].mxu1 }
 0x177   : > { %v1047_v44 = vpop.f32.mrb[1].mxu1 }
 0x178   : > { %v1048_v45 = vadd.f32 %v1047_v44, %v1046_v43 }
 0x17a   : > { %v1049_v46 = vpop.f32.mrb[2].mxu1 }
 0x17b   : > { %v1050_v47 = vpop.f32.mrb[3].mxu1 }
 0x17c   : > { %v1051_v48 = vadd.f32 %v1050_v47, %v1049_v46 }
 0x196   : > { %v1084_v53 = vpop.f32.mrb[4].mxu1 }
 0x197   : > { %v1085_v30 = vpop.f32.mrb[5].mxu1 }
 0x198   : > { %v1086_v54 = vadd.f32 %v1085_v30, %v1084_v53 }
 0x19a   : > { %v797_v32 = vadd.f32 %v1086_v54, %v1048_v45  ;;  %v1087_v56 = vpop.f32.mrb[6].mxu1 }
 0x19b   : > { %v1088_v38 = vpop.f32.mrb[7].mxu1 }
 0x19c   : > { %v845_v57 = vadd.f32 %v839_v55, %v797_v32  ;;  %v1089_v58 = vadd.f32 %v1088_v38, %v1087_v56 }
 0x19e   : > { %851 = vst [vmem:[%s277_s8 + $0x10] sm:$0xff] %v845_v57  ;;  %v802_v59 = vadd.f32 %v1089_v58, %v1051_v48 }
 0x1a0   : > { %v848_v60 = vadd.f32 %v839_v55, %v802_v59 }
 0x1a2   : > { %854 = vst [vmem:[%s277_s8 + $0x28] sm:$0xff] %v848_v60 }
 0x1cf   : > { %v644_v2 = vpop.f32.mrb[0].mxu0 }
 0x1d0   : > { %v843_v3 = vadd.f32 %v831_v63, %v644_v2  ;;  %v646_v4 = vpop.f32.mrb[1].mxu0 }
 0x1d1   : > { %v844_v5 = vadd.f32 %v835_v0, %v646_v4 }
 0x1d2   : > { %849 = vst [vmem:[%s277_s8] sm:$0xff] %v843_v3 }
 0x1d3   : > { %850 = vst [vmem:[%s277_s8 + $0x8] sm:$0xff] %v844_v5  ;;  %v650_v6 = vpop.f32.mrb[2].mxu0 }
 0x1d4   : > { %v846_v7 = vadd.f32 %v831_v63, %v650_v6  ;;  %v652_v8 = vpop.f32.mrb[3].mxu0 }
 0x1d5   : > { %v847_v9 = vadd.f32 %v835_v0, %v652_v8 }
 0x1d6   : > { %852 = vst [vmem:[%s277_s8 + $0x18] sm:$0xff] %v846_v7 }
 0x1d7   : > { %853 = vst [vmem:[%s277_s8 + $0x20] sm:$0xff] %v847_v9 }
 0x1d8   : > { %1478 = shalt.err (!%p1475_p8)
}
 0x1d9   : > { %s1479_s18 = scalar_lea.hbm %s2017_s23, 768  ;;  %s1483_s6 = scalar_lea.hbm %s2069_s3, 1536 }
 0x1da   : > { %p1480_p10 = scmp.ne.s32.totalorder %s2017_s23, %s1479_s18  ;;  %p1484_p3 = scmp.lt.u32.totalorder %s2017_s23, %s2069_s3 }
 0x1db   : > { %p1485_p2 = scmp.lt.u32.totalorder %s1483_s6, %s1479_s18  ;;  %p1487_p4 = scmp.lt.u32.totalorder %s1479_s18, %s2017_s23 }
 0x1dc   : > { %p1481_p13 = pnand %p1480_p10, %p2094_p6 }
 0x1dd   : > { %p1486_p11 = por %p1485_p2, %p1484_p3 }
 0x1de   : > { %p1482_p7 = pneg %p1481_p13 }
 0x1df   : > { %p1488_p1 = por %p1487_p4, %p1486_p11 }
 0x1e1   : > { %p1489_p12 = pnand %p1488_p1, %p1482_p7 }
 0x1e3   : > { %1492 = shalt.err (!%p1489_p12)
}
 0x1e4   : > { %s1562_s30 = smov 384   ;;  %s1563_s7 = smov 768  }
 0x1e5   : > { %s1564_s8 = smov 24  }
 0x1e6   : > { %1299 = dma.vmem_to_hbm [thread:$0]  (%p2094_p6), %s2012_s25, 768, %s2017_s23, %s856_s15, %s1562_s30, %s1563_s7, %s1564_s8  }
 0x1e7 PF: > { %s887_s27 = sand.u32 1, %s1531_s12   ;;  %p2095_p0 = scmp.ne.s32.totalorder %s2084_s4, 0 }
 0x1e8   : > { %p2096_p9 = scmp.ge.s32.totalorder %s1551_s17, 2  ;;  %s888_s22 = scalar_lea.sflag [#allocation5], %s887_s27 }
 0x1ea   : > { %p1313_p5 = pnand %p2096_p9, %p2095_p0 }
 0x1ec   : > { %1526 = dma.done.wait (!%p1313_p5), %s888_s22, 768  }
 0x1ed   : > { %1528 = vsyncadd (!%p1313_p5), %s888_s22, 4294966528  ;;  %s20_s17 = sadd.s32 1, %s1551_s17   ;;  %s2097_s28 = sld [smem:[#allocation13_spill]] }
 0x1ee   : > { %p17_p8 = scmp.ge.s32.totalorder %s20_s17, 4   ;;  %s2098_s12 = smov %s1535_s13 }
 0x1ef   : > { %s2099_s13 = smov %s1539_s14  ;;  %s2100_s14 = smov %s1633_s24 }
 0x1f0   : > { %s2101_s15 = smov %s1547_s16  ;;  %19 = sbr.rel (!%p17_p8) target bundleno = 9 (0x9), region = 102 }
 0x1f3   : > { %s2102_s16 = smov %s2097_s28 }
 0x1f7   :  { %893 = vsyncpa [#allocation4], 1 }
 0x1f8   :  { %895 = vsyncpa [#allocation4 + $0x1], 1 }
 0x1f9   :  { %896 = vsyncpa [#allocation7], 1 }
 0x1fa   :  { %898 = vsyncpa [#allocation7 + $0x1], 1 }
 0x1fb   :  { %899 = vsyncpa [#allocation5], 1 }
 0x1fc   :  { %901 = vsyncpa [#allocation5 + $0x1], 1 }

</bundles_post_ra>
